<compile_context>
chip_gen: v7x
topology: tpu7x:2x2x1
jax: 0.10.0
libtpu: 0.0.40
codegen_flags: <defaults>
</compile_context>

<pallas_src>
import jax
import jax.numpy as jnp
from jax.experimental import pallas as pl
from jax.experimental.pallas import tpu as pltpu


# Lane-dense flattening widths, tried largest-first (all multiples of 128).
_LANE_WIDTHS = (4096, 2048, 1024, 512, 256, 128)

# ~4 MiB per block: with input + output each double-buffered (~4 buffers) this
# stays well inside v7x's 64 MiB physical VMEM while being big enough to sit
# near the HBM roofline on v5e/v6e/v7x.
_TARGET_TILE_BYTES = 4 * 1024 * 1024
_VMEM_LIMIT_BYTES = 48 * 1024 * 1024


def _identity_kernel(x_ref, o_ref):
    # Straight VMEM tile copy (forward pass is `return X`).
    o_ref[...] = x_ref[...]


def _choose_lane_width(n):
    for lanes in _LANE_WIDTHS:
        if n % lanes == 0:
            return lanes
    return None


def no_normalisation(x, *, force_copy=False):
    """Forward pass of NoNormalisation (identity).

    Fast path (default): return `x` unchanged — no kernel, no HBM traffic.
    `force_copy=True`: materialise the result via a tiled, lane-dense Pallas
    copy kernel (only useful if the caller semantically needs a fresh buffer).
    """
    if not force_copy:
        return x  # Identity: the cheapest correct implementation.

    # Degenerate inputs: nothing to copy / no 2D lane-dense view possible.
    if x.ndim == 0 or x.size == 0:
        return x

    orig_shape = x.shape
    n = x.size
    lanes = _choose_lane_width(n)
    if lanes is None:
        # Total size not a multiple of 128: padding would only add HBM traffic
        # for an identity op, so short-circuit.
        return x

    rows = n // lanes
    x2d = x.reshape(rows, lanes)

    # Row-tile sized for ~_TARGET_TILE_BYTES per block, sublane (8) aligned.
    itemsize = jnp.dtype(x.dtype).itemsize
    tile_r = max(8, _TARGET_TILE_BYTES // (lanes * itemsize))
    tile_r -= tile_r % 8
    if tile_r >= rows:
        tile_r = rows  # single block == full array dims (always legal)
    num_blocks = -(-rows // tile_r)

    out2d = pl.pallas_call(
        _identity_kernel,
        out_shape=jax.ShapeDtypeStruct((rows, lanes), x.dtype),
        grid_spec=pltpu.PrefetchScalarGridSpec(
            num_scalar_prefetch=0,
            grid=(num_blocks,),
            in_specs=[pl.BlockSpec((tile_r, lanes), lambda i: (i, 0))],
            out_specs=pl.BlockSpec((tile_r, lanes), lambda i: (i, 0)),
        ),
        compiler_params=pltpu.CompilerParams(
            # "parallel" lets v7x shard the row axis across its 2 TensorCores;
            # it is a no-op on single-TC v5e/v6e.
            dimension_semantics=("parallel",),
            vmem_limit_bytes=_VMEM_LIMIT_BYTES,
        ),
        # Output aliases the input HBM buffer: no second allocation / fill.
        input_output_aliases={0: 0},
    )(x2d)

    return out2d.reshape(orig_shape)


if __name__ == "__main__":
    key = jax.random.PRNGKey(0)
    # Small NCHW input consistent with the module's usage.
    x = jax.random.normal(key, (2, 4, 16, 16), dtype=jnp.float32)

    # Fast path: identity, no kernel launch.
    y_fast = no_normalisation(x)
    assert y_fast is x

    # Pallas copy path (run under jit so the input->output alias is realised
    # without an eager defensive-copy surprise).
    copy_fn = jax.jit(lambda a: no_normalisation(a, force_copy=True))
    y = jax.block_until_ready(copy_fn(x))

    assert y.shape == x.shape
    assert y.dtype == x.dtype
    assert bool(jnp.array_equal(y, x))

    print("KERNEL_OK")
</pallas_src>

<mosaic_0001>
module attributes {stable_mosaic.version = 11 : i64} {
  func.func @_identity_kernel(%arg0: i32, %arg1: memref<1x2048xf32, #tpu.memory_space<vmem>>, %arg2: memref<1x2048xf32, #tpu.memory_space<vmem>>) attributes {dimension_semantics = [#tpu.dimension_semantics<parallel>], iteration_bounds = array<i64: 1>, scalar_prefetch = 0 : i64, scratch_operands = 0 : i64, tpu.core_type = #tpu.core_type<tc>, window_params = [{transform_indices = @transform_0, window_bounds = array<i64: 1, 2048>}, {transform_indices = @transform_1, window_bounds = array<i64: 1, 2048>}]} {
    %c0 = arith.constant 0 : index
    %c0_0 = arith.constant 0 : index
    %0 = vector.load %arg1[%c0, %c0_0] : memref<1x2048xf32, #tpu.memory_space<vmem>>, vector<1x2048xf32>
    %c0_1 = arith.constant 0 : index
    %c0_2 = arith.constant 0 : index
    %1 = vector.load %arg2[%c0_1, %c0_2] : memref<1x2048xf32, #tpu.memory_space<vmem>>, vector<1x2048xf32>
    tpu.vector_store %arg2[%c0_1, %c0_2], %0 {strides = array<i32>} : memref<1x2048xf32, #tpu.memory_space<vmem>>, vector<1x2048xf32>,
    return
  }
  func.func @transform_0(%arg0: i32) -> (i32, i32) {
    %c0_i32 = arith.constant 0 : i32
    %c0_i32_0 = arith.constant 0 : i32
    return %arg0, %c0_i32 : i32, i32
  }
  func.func @transform_1(%arg0: i32) -> (i32, i32) {
    %c0_i32 = arith.constant 0 : i32
    %c0_i32_0 = arith.constant 0 : i32
    return %arg0, %c0_i32 : i32, i32
  }
}

</mosaic_0001>

<bundles_post_ra>
// kernel: _lambda_.1
= control target key start
LH: loop header
LB: loop body
LE: loop exit
PB: predicated region body
PF: predicated region fallthrough
CT: control target
= control target key end

     0   :  { %s38_s0 = inlined_call_operand.vmem [shape: f32[1,2048], index: 0, kind: input, shape index: {}, may-alias: {0,1}]   ;;  %s39_s1 = inlined_call_operand.vmem [shape: f32[1,2048], index: 1, kind: output, shape index: {}, may-alias: {0,1}]  }
   0x1   :  { %v8_v0 = vld [vmem:[%s38_s0] sm:$0xff]  ;;  %v9_v1 = vld [vmem:[%s38_s0 + $0x8] sm:$0xff] }
   0x2   :  { %10 = vst [vmem:[%s39_s1] sm:$0xff] %v8_v0  ;;  %11 = vst [vmem:[%s39_s1 + $0x8] sm:$0xff] %v9_v1 }

</bundles_post_ra>
